<compile_context>
chip_gen: v6e
topology: v6e:2x2x1
jax: 0.10.0
libtpu: 0.0.40
codegen_flags: <defaults>
</compile_context>

<pallas_src>
import jax
import jax.numpy as jnp
from jax.experimental import pallas as pl
from jax.experimental.pallas import tpu as pltpu

TIME_STEP = 0.1
EPS = 1e-6
N_FEAT = 10         # [T, V, E, CFLA, CFK, CALA, CBK, VF, VA, VB]
N_MIG = 4           # [JLA, JK, JVA, JVB]
TILE_N_MAX = 32768  # lanes (rows of the original (..., 10) layout) per grid step


def _round_up(x, m):
    return (x + m - 1) // m * m


def _physics_kernel(mig_ref, feat_ref, out_ref):
    """mig_ref: (4, tile_n), feat_ref: (10, tile_n), out_ref: (10, tile_n)."""
    feat = feat_ref[...].astype(jnp.float32)
    mig = mig_ref[...].astype(jnp.float32)

    # deltas over one time step, one dense (4, tile_n) op: rows = [dLA, dK, dVA, dVB]
    d = mig * TIME_STEP
    dLA = d[0:1]
    dK = d[1:2]
    dVA = d[2:3]
    dVB = d[3:4]

    # old volumes
    VF = feat[7:8]
    VA = feat[8:9]
    VB = feat[9:10]

    # volume update
    nVF = VF - dVA - dVB
    nVA = VA + dVA
    nVB = VB + dVB

    # one reciprocal per compartment (EUP); feed reciprocal reused for both feed channels
    inv_F = pl.reciprocal(nVF + EPS, approx=False)
    inv_A = pl.reciprocal(nVA + EPS, approx=False)
    inv_B = pl.reciprocal(nVB + EPS, approx=False)

    # mole + concentration update; feed compartment handled as one (2, tile_n) block
    nCF = (feat[3:5] * VF - d[0:2]) * inv_F    # [nCFLA, nCFK]
    nCA = (feat[5:6] * VA + dLA) * inv_A       # nCALA
    nCB = (feat[6:7] * VB + dK) * inv_B        # nCBK

    # assemble all ten channels (T, V, E pass through) and store the block once
    out = jnp.concatenate([feat[0:3], nCF, nCA, nCB, nVF, nVA, nVB], axis=0)
    out_ref[...] = out.astype(out_ref.dtype)


def _physics_pallas_cm(mig_cm, feat_cm, out_dtype):
    """Channel-major pallas_call: mig_cm (4, N), feat_cm (10, N) -> (10, N)."""
    n = feat_cm.shape[1]

    if n <= 128:
        tile_n = n  # single block; lane dim equals the full array dim (layout-legal)
    else:
        # 128-aligned lane tile, capped so the grid has >= 2 steps (v7x megacore)
        tile_n = min(TILE_N_MAX, _round_up((n + 1) // 2, 128))
    grid = (pl.cdiv(n, tile_n),)

    in_bytes = (feat_cm.size * feat_cm.dtype.itemsize
                + mig_cm.size * mig_cm.dtype.itemsize)
    out_bytes = N_FEAT * n * jnp.dtype(out_dtype).itemsize
    cost = pl.CostEstimate(flops=30 * n, transcendentals=3 * n,
                           bytes_accessed=in_bytes + out_bytes)

    return pl.pallas_call(
        _physics_kernel,
        out_shape=jax.ShapeDtypeStruct((N_FEAT, n), out_dtype),
        grid_spec=pl.GridSpec(
            grid=grid,
            in_specs=[
                pl.BlockSpec((N_MIG, tile_n), lambda i: (0, i)),
                pl.BlockSpec((N_FEAT, tile_n), lambda i: (0, i)),
            ],
            out_specs=pl.BlockSpec((N_FEAT, tile_n), lambda i: (0, i)),
        ),
        compiler_params=pltpu.CompilerParams(
            dimension_semantics=("parallel",),
            vmem_limit_bytes=32 * 1024 * 1024,
        ),
        cost_estimate=cost,
    )(mig_cm, feat_cm)


@jax.jit
def physics_layer_channel_major(migrations_cm, features_cm):
    """Recommended API: channel-major (SoA) in and out.

    migrations_cm: (4, N), features_cm: (10, N) -> (10, N).
    No relayout passes at all; keep rollout state in this layout.
    """
    assert features_cm.shape[0] == N_FEAT
    assert migrations_cm.shape[0] == N_MIG
    assert features_cm.shape[1] == migrations_cm.shape[1]
    out_dtype = jnp.result_type(features_cm.dtype, migrations_cm.dtype)
    return _physics_pallas_cm(migrations_cm, features_cm, out_dtype)


@jax.jit
def physics_layer(migrations, features):
    """Drop-in equivalent of PhysicsLayer.forward(migrations, features).

    Accepts (..., 4) migrations and (..., 10) features like the PyTorch module.
    Only the unavoidable AoS<->SoA XLA transposes remain (native dtypes, no pad /
    astype / slice passes).  For repeated rollouts prefer
    `physics_layer_channel_major` and keep the state channel-major so the
    conversion cost disappears entirely.
    """
    assert features.shape[-1] == N_FEAT
    assert migrations.shape[-1] == N_MIG
    assert features.shape[:-1] == migrations.shape[:-1]

    lead_shape = features.shape[:-1]
    n_rows = 1
    for dim in lead_shape:
        n_rows *= dim

    out_dtype = jnp.result_type(features.dtype, migrations.dtype)

    feat_cm = jnp.transpose(features.reshape(n_rows, N_FEAT))   # (10, N)
    mig_cm = jnp.transpose(migrations.reshape(n_rows, N_MIG))   # (4, N)

    out_cm = _physics_pallas_cm(mig_cm, feat_cm, out_dtype)     # (10, N)

    return jnp.transpose(out_cm).reshape(*lead_shape, N_FEAT)


def _physics_layer_ref(migrations, features):
    """Pure-JAX reference (mirrors the PyTorch forward) for correctness check."""
    T, V, E = features[..., 0:1], features[..., 1:2], features[..., 2:3]
    CFLA, CFK = features[..., 3:4], features[..., 4:5]
    CALA, CBK = features[..., 5:6], features[..., 6:7]
    VF, VA, VB = features[..., 7:8], features[..., 8:9], features[..., 9:10]
    NFLA, NFK, NALA, NBK = CFLA * VF, CFK * VF, CALA * VA, CBK * VB
    JLA, JK = migrations[..., 0:1], migrations[..., 1:2]
    JVA, JVB = migrations[..., 2:3], migrations[..., 3:4]
    dLA, dK, dVA, dVB = (JLA * TIME_STEP, JK * TIME_STEP,
                         JVA * TIME_STEP, JVB * TIME_STEP)
    nVF, nVA, nVB = VF - dVA - dVB, VA + dVA, VB + dVB
    nNFLA, nNFK, nNALA, nNBK = NFLA - dLA, NFK - dK, NALA + dLA, NBK + dK
    nCFLA = nNFLA / (nVF + EPS)
    nCFK = nNFK / (nVF + EPS)
    nCALA = nNALA / (nVA + EPS)
    nCBK = nNBK / (nVB + EPS)
    return jnp.concatenate(
        [T, V, E, nCFLA, nCFK, nCALA, nCBK, nVF, nVA, nVB], axis=-1
    )


if __name__ == "__main__":
    key = jax.random.PRNGKey(0)
    k1, k2 = jax.random.split(key)

    batch, seq = 2, 8
    # features: physical quantities, keep them positive-ish
    features = jax.random.uniform(
        k1, (batch, seq, N_FEAT), dtype=jnp.float32, minval=0.1, maxval=1.0
    )
    # migrations: small fluxes (can be negative)
    migrations = jax.random.normal(k2, (batch, seq, N_MIG), dtype=jnp.float32) * 0.05

    ref = _physics_layer_ref(migrations, features)

    # drop-in (PyTorch-layout) path
    out = jax.block_until_ready(physics_layer(migrations, features))
    assert out.shape == (batch, seq, N_FEAT)
    assert out.dtype == features.dtype
    assert jnp.allclose(out, ref, atol=1e-5, rtol=1e-5), "AoS path mismatch vs reference"

    # channel-major (recommended, zero-relayout) path
    n = batch * seq
    feat_cm = jnp.transpose(features.reshape(n, N_FEAT))
    mig_cm = jnp.transpose(migrations.reshape(n, N_MIG))
    out_cm = jax.block_until_ready(physics_layer_channel_major(mig_cm, feat_cm))
    assert jnp.allclose(
        jnp.transpose(out_cm).reshape(batch, seq, N_FEAT), ref, atol=1e-5, rtol=1e-5
    ), "channel-major path mismatch vs reference"

    print("KERNEL_OK")
</pallas_src>

<mosaic_0001>
module attributes {stable_mosaic.version = 11 : i64} {
  func.func @_physics_kernel(%arg0: i32, %arg1: memref<4x16xf32, #tpu.memory_space<vmem>>, %arg2: memref<10x16xf32, #tpu.memory_space<vmem>>, %arg3: memref<10x16xf32, #tpu.memory_space<vmem>>) attributes {dimension_semantics = [#tpu.dimension_semantics<parallel>], iteration_bounds = array<i64: 1>, scalar_prefetch = 0 : i64, scratch_operands = 0 : i64, tpu.core_type = #tpu.core_type<tc>, window_params = [{transform_indices = @transform_0, window_bounds = array<i64: 4, 16>}, {transform_indices = @transform_1, window_bounds = array<i64: 10, 16>}, {transform_indices = @transform_2, window_bounds = array<i64: 10, 16>}]} {
    %c0 = arith.constant 0 : index
    %c0_0 = arith.constant 0 : index
    %0 = vector.load %arg2[%c0, %c0_0] : memref<10x16xf32, #tpu.memory_space<vmem>>, vector<10x16xf32>
    %c0_1 = arith.constant 0 : index
    %c0_2 = arith.constant 0 : index
    %1 = vector.load %arg1[%c0_1, %c0_2] : memref<4x16xf32, #tpu.memory_space<vmem>>, vector<4x16xf32>
    %cst = arith.constant 1.000000e-01 : f32
    %2 = vector.broadcast %cst : f32 to vector<4x16xf32>
    %3 = arith.mulf %1, %2 : vector<4x16xf32>
    %4 = vector.extract_strided_slice %3 {offsets = [0, 0], sizes = [1, 16], strides = [1, 1]} : vector<4x16xf32> to vector<1x16xf32>
    %5 = vector.extract_strided_slice %3 {offsets = [1, 0], sizes = [1, 16], strides = [1, 1]} : vector<4x16xf32> to vector<1x16xf32>
    %6 = vector.extract_strided_slice %3 {offsets = [2, 0], sizes = [1, 16], strides = [1, 1]} : vector<4x16xf32> to vector<1x16xf32>
    %7 = vector.extract_strided_slice %3 {offsets = [3, 0], sizes = [1, 16], strides = [1, 1]} : vector<4x16xf32> to vector<1x16xf32>
    %8 = vector.extract_strided_slice %0 {offsets = [7, 0], sizes = [1, 16], strides = [1, 1]} : vector<10x16xf32> to vector<1x16xf32>
    %9 = vector.extract_strided_slice %0 {offsets = [8, 0], sizes = [1, 16], strides = [1, 1]} : vector<10x16xf32> to vector<1x16xf32>
    %10 = vector.extract_strided_slice %0 {offsets = [9, 0], sizes = [1, 16], strides = [1, 1]} : vector<10x16xf32> to vector<1x16xf32>
    %11 = arith.subf %8, %6 : vector<1x16xf32>
    %12 = arith.subf %11, %7 : vector<1x16xf32>
    %13 = arith.addf %9, %6 : vector<1x16xf32>
    %14 = arith.addf %10, %7 : vector<1x16xf32>
    %cst_3 = arith.constant 9.99999997E-7 : f32
    %15 = vector.broadcast %cst_3 : f32 to vector<1x16xf32>
    %16 = arith.addf %12, %15 : vector<1x16xf32>
    %17 = tpu.reciprocal %16 : vector<1x16xf32> -> vector<1x16xf32>
    %cst_4 = arith.constant 9.99999997E-7 : f32
    %18 = vector.broadcast %cst_4 : f32 to vector<1x16xf32>
    %19 = arith.addf %13, %18 : vector<1x16xf32>
    %20 = tpu.reciprocal %19 : vector<1x16xf32> -> vector<1x16xf32>
    %cst_5 = arith.constant 9.99999997E-7 : f32
    %21 = vector.broadcast %cst_5 : f32 to vector<1x16xf32>
    %22 = arith.addf %14, %21 : vector<1x16xf32>
    %23 = tpu.reciprocal %22 : vector<1x16xf32> -> vector<1x16xf32>
    %24 = vector.extract_strided_slice %0 {offsets = [3, 0], sizes = [2, 16], strides = [1, 1]} : vector<10x16xf32> to vector<2x16xf32>
    %25 = vector.broadcast %8 : vector<1x16xf32> to vector<2x16xf32>
    %26 = arith.mulf %24, %25 : vector<2x16xf32>
    %27 = vector.extract_strided_slice %3 {offsets = [0, 0], sizes = [2, 16], strides = [1, 1]} : vector<4x16xf32> to vector<2x16xf32>
    %28 = arith.subf %26, %27 : vector<2x16xf32>
    %29 = vector.broadcast %17 : vector<1x16xf32> to vector<2x16xf32>
    %30 = arith.mulf %28, %29 : vector<2x16xf32>
    %31 = vector.extract_strided_slice %0 {offsets = [5, 0], sizes = [1, 16], strides = [1, 1]} : vector<10x16xf32> to vector<1x16xf32>
    %32 = arith.mulf %31, %9 : vector<1x16xf32>
    %33 = arith.addf %32, %4 : vector<1x16xf32>
    %34 = arith.mulf %33, %20 : vector<1x16xf32>
    %35 = vector.extract_strided_slice %0 {offsets = [6, 0], sizes = [1, 16], strides = [1, 1]} : vector<10x16xf32> to vector<1x16xf32>
    %36 = arith.mulf %35, %10 : vector<1x16xf32>
    %37 = arith.addf %36, %5 : vector<1x16xf32>
    %38 = arith.mulf %37, %23 : vector<1x16xf32>
    %39 = vector.extract_strided_slice %0 {offsets = [0, 0], sizes = [3, 16], strides = [1, 1]} : vector<10x16xf32> to vector<3x16xf32>
    %40 = tpu.concatenate %39, %30, %34, %38, %12, %13, %14 in 0 : vector<3x16xf32>, vector<2x16xf32>, vector<1x16xf32>, vector<1x16xf32>, vector<1x16xf32>, vector<1x16xf32>, vector<1x16xf32> -> vector<10x16xf32>
    %c0_6 = arith.constant 0 : index
    %c0_7 = arith.constant 0 : index
    %41 = vector.load %arg3[%c0_6, %c0_7] : memref<10x16xf32, #tpu.memory_space<vmem>>, vector<10x16xf32>
    tpu.vector_store %arg3[%c0_6, %c0_7], %40 {strides = array<i32>} : memref<10x16xf32, #tpu.memory_space<vmem>>, vector<10x16xf32>,
    return
  }
  func.func @transform_0(%arg0: i32) -> (i32, i32) {
    %c0_i32 = arith.constant 0 : i32
    %c0_i32_0 = arith.constant 0 : i32
    return %c0_i32, %arg0 : i32, i32
  }
  func.func @transform_1(%arg0: i32) -> (i32, i32) {
    %c0_i32 = arith.constant 0 : i32
    %c0_i32_0 = arith.constant 0 : i32
    return %c0_i32, %arg0 : i32, i32
  }
  func.func @transform_2(%arg0: i32) -> (i32, i32) {
    %c0_i32 = arith.constant 0 : i32
    %c0_i32_0 = arith.constant 0 : i32
    return %c0_i32, %arg0 : i32, i32
  }
}

</mosaic_0001>

<bundles_post_ra>
// kernel: physics_layer.1
= control target key start
LH: loop header
LB: loop body
LE: loop exit
PB: predicated region body
PF: predicated region fallthrough
CT: control target
= control target key end

     0   :  { %v29_v7 = vlaneseq  ;;  %vm61_vm0 = vcmask 123904   ;;  %vm51_vm1 = vcmask 1042432   ;;  %vm53_vm2 = vcmask 1044480   ;;  %s101_s0 = inlined_call_operand.vmem [shape: f32[4,16], index: 0, kind: input, shape index: {}]   ;;  %s102_s1 = inlined_call_operand.vmem [shape: f32[10,16], index: 1, kind: input, shape index: {}]   ;;  %s103_s2 = inlined_call_operand.vmem [shape: f32[10,16], index: 2, kind: output, shape index: {}]  }
   0x1   :  { %v13_v0 = vld [vmem:[%s101_s0] sm:$0xf]  ;;  %v12_v3 = vld [vmem:[%s102_s1 + $0x8] sm:$0x3]  ;;  %vm55_vm3 = vcmask 1045504   ;;  %vm57_vm4 = vcmask 1046528  }
   0x2   :  { %v14_v1 = vmul.f32 0.1, %v13_v0  ;;  %v11_v2 = vld [vmem:[%s102_s1] sm:$0xff]  ;;  %v30_v12 = vshrl.u32 %v29_v7, 7  ;;  %v43_v15 = vrot.slane %v12_v3, 3  ;;  %vm59_vm5 = vcmask 130048  }
   0x4   :  { %v16_v4 = vrot.slane %v14_v1, 3  ;;  %v19_v5 = vrot.slane %v14_v1, 4  ;;  %v22_v6 = vrot.slane %v14_v1, 2  ;;  %v31_v14 = vsub.s32 7, %v30_v12 }
   0x5   :  { %v45_v17 = vmul.f32 %v43_v15, %v11_v2  ;;  %v34_v19 = vrot.slane %v14_v1, 5 }
   0x6   :  { %v18_v8 = vsub.f32 %v11_v2, %v16_v4  ;;  %v24_v9 = vadd.f32 %v22_v6, %v12_v3  ;;  %v32_v16 = vrot.slane %v11_v2, %v31_v14 }
   0x7   :  { %v46_v21 = vadd.f32 %v45_v17, %v16_v4 }
   0x8   :  { %v21_v10 = vsub.f32 %v18_v8, %v19_v5  ;;  %v27_v11 = vadd.f32 1e-06, %v24_v9  ;;  %62 = vst.msk [vmem:[%s103_s2 + $0x8] sm:$0x3] %vm61_vm0, %v24_v9  ;;  %v33_v18 = vmul.f32 %v32_v16, %v11_v2 }
   0xa   :  { %v25_v13 = vadd.f32 1e-06, %v21_v10  ;;  %67 = vrcp.f32 %v27_v11  ;;  %v36_v22 = vsub.f32 %v33_v18, %v34_v19 }
   0xc   :  { %69 = vrcp.f32 %v25_v13 }
  0x17   :  { %v68_v20 = vpop.eup %67 }
  0x18   :  { %v48_v23 = vrot.slane %v68_v20, 3 }
  0x19   :  { %v70_v24 = vpop.eup %69 }
  0x1a   :  { %v40_v25 = vrot.slane %v70_v24, %v31_v14  ;;  %v50_v26 = vmul.f32 %v48_v23, %v46_v21 }
  0x1c   :  { %v41_v27 = vmul.f32 %v40_v25, %v36_v22 }
  0x1e   :  { %v52_v28 = vsel %vm51_vm1, %v11_v2, %v41_v27 }
  0x1f   :  { %v54_v29 = vsel %vm53_vm2, %v52_v28, %v50_v26 }
  0x20   :  { %v56_v30 = vsel %vm55_vm3, %v54_v29, %v50_v26 }
  0x21   :  { %v58_v31 = vsel %vm57_vm4, %v56_v30, %v21_v10 }
  0x22   :  { %60 = vst.msk [vmem:[%s103_s2] sm:$0xff] %vm59_vm5, %v58_v31 }

</bundles_post_ra>
